<compile_context>
chip_gen: v7x
topology: tpu7x:2x2x1
jax: 0.10.0
libtpu: 0.0.40
codegen_flags: <defaults>
</compile_context>

<pallas_src>
import functools

import jax
import jax.numpy as jnp
from jax import lax
from jax.experimental import pallas as pl
from jax.experimental.pallas import tpu as pltpu


def _sdp_kernel(q_ref, k_ref, v_ref, o_ref, attn_ref, *, scale, compute_dtype):
    # Blocks: q (1, tq, D), k/v (1, S, D), out (1, tq, D), attn (1, tq, S).
    q = q_ref[0]
    k = k_ref[0]
    v = v_ref[0]
    if compute_dtype is not None:          # opt-in bf16 MXU path for f32 inputs
        q = q.astype(compute_dtype)
        k = k.astype(compute_dtype)
        v = v.astype(compute_dtype)
    q = q * jnp.asarray(scale, q.dtype)    # fold 1/sqrt(D) into Q: O(tq*D) VPU

    # score = (Q * scale) @ K^T — contract last dims of both operands, f32
    # accumulation on the MXU, no explicit transpose of the K tile.
    score = lax.dot_general(
        q, k, (((1,), (1,)), ((), ())),
        preferred_element_type=jnp.float32,
    )                                      # (tq, S) f32

    # Numerically stable softmax pieces, in f32.
    m = jnp.max(score, axis=-1, keepdims=True)
    p = jnp.exp(score - m)                 # (tq, S) unnormalized probabilities
    denom = jnp.sum(p, axis=-1, keepdims=True)

    # PV matmul on unnormalized p (MXU doesn't wait for the O(tq*S) normalize);
    # normalize the (tq, D) result instead.
    out = jnp.dot(p.astype(v.dtype), v, preferred_element_type=jnp.float32)

    inv = 1.0 / denom                      # exact: rows of attn sum to 1
    o_ref[0] = (out * inv).astype(o_ref.dtype)
    attn_ref[0] = (p * inv).astype(attn_ref.dtype)


def _pick_query_tile(S, sublane, target=512):
    """Largest divisor of S that is <= target, preferring MXU-friendly sizes."""
    if S <= target:
        return S
    for pref in (256, 128):                # keep the matmul M dimension full
        t = (target // pref) * pref
        while t >= pref:
            if S % t == 0:
                return t
            t -= pref
    t = (target // sublane) * sublane      # fall back to sublane-aligned
    while t >= sublane:
        if S % t == 0:
            return t
        t -= sublane
    return S


def _next_smaller_tile(S, tq, sublane):
    """Largest sublane-aligned divisor of S strictly smaller than tq."""
    t = ((tq - 1) // sublane) * sublane
    while t >= sublane:
        if t < tq and S % t == 0:
            return t
        t -= sublane
    return None


def _estimate_vmem(tq, S, D, in_itemsize, out_itemsize, kv_buffers):
    q_bytes = 2 * tq * D * in_itemsize                  # double-buffered Q block
    kv_bytes = 2 * kv_buffers * S * D * in_itemsize     # resident K + V
    o_bytes = 2 * tq * D * out_itemsize                 # double-buffered out
    attn_bytes = 2 * tq * S * out_itemsize              # double-buffered attn
    tmp_bytes = 2 * tq * S * 4                          # f32 score / p live temps
    return q_bytes + kv_bytes + o_bytes + attn_bytes + tmp_bytes


def _vmem_budget_bytes():
    """~75% of physical per-core VMEM; conservative fallback = 48 MiB (v7x)."""
    cap = None
    try:
        cap = getattr(pltpu.get_tpu_info(), "vmem_capacity_bytes", None)
    except Exception:
        cap = None
    if not cap:
        cap = 64 * 1024 * 1024
    return int(cap) * 3 // 4


def sdp_attention(query, key, value, *, tq=None, compute_dtype=None):
    """Pallas scaled dot-product attention.  query/key/value: (B, S, D)."""
    B, S, D = query.shape
    in_itemsize = jnp.dtype(query.dtype).itemsize
    out_itemsize = in_itemsize
    sublane = {1: 32, 2: 16}.get(in_itemsize, 8)
    budget = _vmem_budget_bytes()

    # Single-buffer K/V when they are big: their block index is constant over
    # the inner (qi) axis, so the extra buffer only matters at batch edges.
    kv_double_bytes = 2 * 2 * S * D * in_itemsize
    kv_buffers = 1 if kv_double_bytes > 8 * 1024 * 1024 else 2

    if tq is None:
        tq = _pick_query_tile(S, sublane)
        # Shrink the query tile until the per-step footprint fits the budget.
        while _estimate_vmem(tq, S, D, in_itemsize, out_itemsize,
                             kv_buffers) > budget:
            nxt = _next_smaller_tile(S, tq, sublane)
            if nxt is None:
                break
            tq = nxt
    assert S % tq == 0, f"query tile {tq} must divide sequence length {S}"
    # TODO(synk): for very long S where even the smallest tile does not fit,
    # add a kv grid axis ("arbitrary") with online softmax instead of keeping
    # K/V fully resident.

    scale = 1.0 / float(D) ** 0.5
    kernel = functools.partial(_sdp_kernel, scale=scale,
                               compute_dtype=compute_dtype)

    q_spec = pl.BlockSpec((1, tq, D), lambda b, qi: (b, qi, 0))
    out_spec = pl.BlockSpec((1, tq, D), lambda b, qi: (b, qi, 0))
    attn_spec = pl.BlockSpec((1, tq, S), lambda b, qi: (b, qi, 0))
    kv_index = lambda b, qi: (b, 0, 0)
    if kv_buffers == 1:
        kv_spec = pl.BlockSpec((1, S, D), kv_index,
                               pipeline_mode=pl.Buffered(1))
    else:
        kv_spec = pl.BlockSpec((1, S, D), kv_index)

    est = _estimate_vmem(tq, S, D, in_itemsize, out_itemsize, kv_buffers)
    vmem_limit = int(min(budget, max(32 * 1024 * 1024, 2 * est)))

    cost = pl.CostEstimate(
        flops=4 * B * S * S * D,                       # QK^T + PV matmuls
        transcendentals=B * S * S,                     # exp
        bytes_accessed=(4 * B * S * D) * in_itemsize   # Q,K,V reads + out write
        + B * S * S * out_itemsize,                    # attn write (dominant)
    )

    out_shapes = (
        jax.ShapeDtypeStruct((B, S, D), query.dtype),  # attention output
        jax.ShapeDtypeStruct((B, S, S), query.dtype),  # attention weights
    )

    return pl.pallas_call(
        kernel,
        out_shape=out_shapes,
        grid_spec=pltpu.PrefetchScalarGridSpec(
            num_scalar_prefetch=0,
            grid=(B, S // tq),
            in_specs=[q_spec, kv_spec, kv_spec],
            out_specs=[out_spec, attn_spec],
        ),
        compiler_params=pltpu.CompilerParams(
            dimension_semantics=("parallel", "parallel"),
            vmem_limit_bytes=vmem_limit,
        ),
        cost_estimate=cost,
    )(query, key, value)


def sdp_attention_ref(query, key, value):
    """Plain-JAX reference matching the PyTorch forward."""
    d = query.shape[-1]
    score = jnp.einsum("bqd,bkd->bqk", query, key) / jnp.sqrt(jnp.float32(d))
    attn = jax.nn.softmax(score, axis=-1)
    out = jnp.einsum("bqk,bkd->bqd", attn, value)
    return out, attn


if __name__ == "__main__":
    # Small, deterministic example shapes: batch=2, seq=8, hidden=32.
    B, S, D = 2, 8, 32
    key0 = jax.random.PRNGKey(0)
    kq, kk, kv = jax.random.split(key0, 3)
    query = jax.random.normal(kq, (B, S, D), dtype=jnp.float32)
    keyt = jax.random.normal(kk, (B, S, D), dtype=jnp.float32)
    value = jax.random.normal(kv, (B, S, D), dtype=jnp.float32)

    out, attn = sdp_attention(query, keyt, value)
    jax.block_until_ready((out, attn))

    out_ref, attn_ref = sdp_attention_ref(query, keyt, value)
    assert jnp.allclose(out, out_ref, atol=1e-3, rtol=1e-3)
    assert jnp.allclose(attn, attn_ref, atol=1e-3, rtol=1e-3)

    print("KERNEL_OK")
</pallas_src>

<mosaic_0001>
module attributes {stable_mosaic.version = 11 : i64} {
  func.func @_sdp_kernel(%arg0: i32, %arg1: i32, %arg2: memref<1x8x32xf32, #tpu.memory_space<vmem>>, %arg3: memref<1x8x32xf32, #tpu.memory_space<vmem>>, %arg4: memref<1x8x32xf32, #tpu.memory_space<vmem>>, %arg5: memref<1x8x32xf32, #tpu.memory_space<vmem>>, %arg6: memref<1x8x8xf32, #tpu.memory_space<vmem>>) attributes {dimension_semantics = [#tpu.dimension_semantics<parallel>, #tpu.dimension_semantics<parallel>], iteration_bounds = array<i64: 2, 1>, scalar_prefetch = 0 : i64, scratch_operands = 0 : i64, tpu.core_type = #tpu.core_type<tc>, window_params = [{transform_indices = @transform_0, window_bounds = array<i64: 1, 8, 32>}, {transform_indices = @transform_1, window_bounds = array<i64: 1, 8, 32>}, {transform_indices = @transform_2, window_bounds = array<i64: 1, 8, 32>}, {transform_indices = @transform_3, window_bounds = array<i64: 1, 8, 32>}, {transform_indices = @transform_4, window_bounds = array<i64: 1, 8, 8>}]} {
    %c0 = arith.constant 0 : index
    %c0_0 = arith.constant 0 : index
    %c0_1 = arith.constant 0 : index
    %0 = vector.load %arg2[%c0, %c0_0, %c0_1] : memref<1x8x32xf32, #tpu.memory_space<vmem>>, vector<1x8x32xf32>
    %1 = vector.shape_cast %0 : vector<1x8x32xf32> to vector<8x32xf32>
    %c0_2 = arith.constant 0 : index
    %c0_3 = arith.constant 0 : index
    %c0_4 = arith.constant 0 : index
    %2 = vector.load %arg3[%c0_2, %c0_3, %c0_4] : memref<1x8x32xf32, #tpu.memory_space<vmem>>, vector<1x8x32xf32>
    %3 = vector.shape_cast %2 : vector<1x8x32xf32> to vector<8x32xf32>
    %c0_5 = arith.constant 0 : index
    %c0_6 = arith.constant 0 : index
    %c0_7 = arith.constant 0 : index
    %4 = vector.load %arg4[%c0_5, %c0_6, %c0_7] : memref<1x8x32xf32, #tpu.memory_space<vmem>>, vector<1x8x32xf32>
    %5 = vector.shape_cast %4 : vector<1x8x32xf32> to vector<8x32xf32>
    %cst = arith.constant 0.176776692 : f32
    %6 = vector.broadcast %cst : f32 to vector<8x32xf32>
    %7 = arith.mulf %1, %6 : vector<8x32xf32>
    %cst_8 = arith.constant dense<0.000000e+00> : vector<8x8xf32>
    %8 = tpu.matmul %7, %3, %cst_8 {dimension_numbers = #tpu.dot_dimension_numbers<[1], [1], [0], [0], [0, 0, 1, 0], [], []>} : vector<8x32xf32>, vector<8x32xf32>, vector<8x8xf32> -> vector<8x8xf32>
    %cst_9 = arith.constant dense<0xFF800000> : vector<8xf32>
    %9 = vector.multi_reduction <maximumf>, %8, %cst_9 [1] : vector<8x8xf32> to vector<8xf32>
    %10 = vector.shape_cast %9 : vector<8xf32> to vector<8x1xf32>
    %11 = vector.broadcast %10 : vector<8x1xf32> to vector<8x8xf32>
    %12 = arith.subf %8, %11 : vector<8x8xf32>
    %13 = math.exp %12 : vector<8x8xf32>
    %cst_10 = arith.constant dense<0.000000e+00> : vector<8xf32>
    %14 = vector.multi_reduction <add>, %13, %cst_10 [1] : vector<8x8xf32> to vector<8xf32>
    %15 = vector.shape_cast %14 : vector<8xf32> to vector<8x1xf32>
    %cst_11 = arith.constant dense<0.000000e+00> : vector<8x32xf32>
    %16 = tpu.matmul %13, %5, %cst_11 {dimension_numbers = #tpu.dot_dimension_numbers<[1], [0], [0], [1], [0, 0, 1, 1], [], []>} : vector<8x8xf32>, vector<8x32xf32>, vector<8x32xf32> -> vector<8x32xf32>
    %cst_12 = arith.constant 1.000000e+00 : f32
    %17 = vector.broadcast %cst_12 : f32 to vector<8x1xf32>
    %18 = arith.divf %17, %15 : vector<8x1xf32>
    %19 = vector.broadcast %18 : vector<8x1xf32> to vector<8x32xf32>
    %20 = arith.mulf %16, %19 : vector<8x32xf32>
    %c0_13 = arith.constant 0 : index
    %c0_14 = arith.constant 0 : index
    %c0_15 = arith.constant 0 : index
    %21 = vector.load %arg5[%c0_13, %c0_14, %c0_15] : memref<1x8x32xf32, #tpu.memory_space<vmem>>, vector<1x8x32xf32>
    %22 = vector.shape_cast %21 : vector<1x8x32xf32> to vector<8x32xf32>
    %23 = vector.shape_cast %20 : vector<8x32xf32> to vector<1x8x32xf32>
    tpu.vector_store %arg5[%c0_13, %c0_14, %c0_15], %23 {strides = array<i32>} : memref<1x8x32xf32, #tpu.memory_space<vmem>>, vector<1x8x32xf32>,
    %24 = vector.broadcast %18 : vector<8x1xf32> to vector<8x8xf32>
    %25 = arith.mulf %13, %24 : vector<8x8xf32>
    %c0_16 = arith.constant 0 : index
    %c0_17 = arith.constant 0 : index
    %c0_18 = arith.constant 0 : index
    %26 = vector.load %arg6[%c0_16, %c0_17, %c0_18] : memref<1x8x8xf32, #tpu.memory_space<vmem>>, vector<1x8x8xf32>
    %27 = vector.shape_cast %26 : vector<1x8x8xf32> to vector<8x8xf32>
    %28 = vector.shape_cast %25 : vector<8x8xf32> to vector<1x8x8xf32>
    tpu.vector_store %arg6[%c0_16, %c0_17, %c0_18], %28 {strides = array<i32>} : memref<1x8x8xf32, #tpu.memory_space<vmem>>, vector<1x8x8xf32>,
    return
  }
  func.func @transform_0(%arg0: i32, %arg1: i32) -> (i32, i32, i32) {
    %c0_i32 = arith.constant 0 : i32
    %c0_i32_0 = arith.constant 0 : i32
    return %arg0, %arg1, %c0_i32 : i32, i32, i32
  }
  func.func @transform_1(%arg0: i32, %arg1: i32) -> (i32, i32, i32) {
    %c0_i32 = arith.constant 0 : i32
    %c0_i32_0 = arith.constant 0 : i32
    %c0_i32_1 = arith.constant 0 : i32
    return %arg0, %c0_i32, %c0_i32_0 : i32, i32, i32
  }
  func.func @transform_2(%arg0: i32, %arg1: i32) -> (i32, i32, i32) {
    %c0_i32 = arith.constant 0 : i32
    %c0_i32_0 = arith.constant 0 : i32
    %c0_i32_1 = arith.constant 0 : i32
    return %arg0, %c0_i32, %c0_i32_0 : i32, i32, i32
  }
  func.func @transform_3(%arg0: i32, %arg1: i32) -> (i32, i32, i32) {
    %c0_i32 = arith.constant 0 : i32
    %c0_i32_0 = arith.constant 0 : i32
    return %arg0, %arg1, %c0_i32 : i32, i32, i32
  }
  func.func @transform_4(%arg0: i32, %arg1: i32) -> (i32, i32, i32) {
    %c0_i32 = arith.constant 0 : i32
    %c0_i32_0 = arith.constant 0 : i32
    return %arg0, %arg1, %c0_i32 : i32, i32, i32
  }
}

</mosaic_0001>

<bundles_post_ra>
// kernel: tpu_custom_call.1
= control target key start
LH: loop header
LB: loop body
LE: loop exit
PB: predicated region body
PF: predicated region fallthrough
CT: control target
= control target key end

     0   :  { %s1343_s0 = inlined_call_operand.hbm [shape: f32[2,8,32], index: 0, kind: input, shape index: {}]   ;;  %s1344_s1 = inlined_call_operand.hbm [shape: f32[2,8,32], index: 1, kind: input, shape index: {}]   ;;  %s1345_s2 = inlined_call_operand.hbm [shape: f32[2,8,32], index: 2, kind: input, shape index: {}]   ;;  %s1346_s3 = inlined_call_operand.hbm [shape: f32[2,8,32], index: 3, kind: output, shape index: {0}]   ;;  %s1347_s4 = inlined_call_operand.hbm [shape: f32[2,8,8], index: 4, kind: output, shape index: {1}]  }
   0x1   :  { %1356 = sst [smem:[#allocation19_spill]] %s1344_s1 }
   0x2   :  { %10 = vsyncpa [#allocation3], 0 }
   0x3   :  { %12 = vsyncpa [#allocation3 + $0x1], 0 }
   0x4   :  { %13 = vsyncpa [#allocation6], 0 }
   0x5   :  { %15 = vsyncpa [#allocation6 + $0x1], 0 }
   0x6   :  { %16 = vsyncpa [#allocation4], 0 }
   0x7   :  { %18 = vsyncpa [#allocation4 + $0x1], 0 }
   0x8   :  { %19 = vsyncpa [#allocation10], 0 }
   0x9   :  { %21 = vsyncpa [#allocation10 + $0x1], 0  ;;  %s1038_s15 = smov 0   ;;  %s1040_s16 = smov 0  }
   0xa   :  { %s1042_s17 = smov 0   ;;  %s1044_s18 = smov 0  }
   0xb   :  { %s1046_s19 = smov 0   ;;  %s1048_s20 = smov 0  }
   0xc LB: > { %1357 = sst [smem:[#allocation15_spill]] %s1000_s19  ;;  %s1069_s21 = sadd.s32 4294967295, %s1004_s20   ;;  %s1004_s20 = sphi %s1048_s20, %s27_s20   ;;  %s1000_s19 = sphi %s1046_s19, %s1381_s19   ;;  %s996_s18 = sphi %s1044_s18, %s1380_s18   ;;  %s992_s17 = sphi %s1042_s17, %s1384_s17   ;;  %s988_s16 = sphi %s1040_s16, %s1383_s16   ;;  %s984_s15 = sphi %s1038_s15, %s1382_s15  }
   0xd   : > { %1358 = sst [smem:[#allocation16_spill]] %s1004_s20  ;;  %s675_s22 = sadd.s32 4294967294, %s1004_s20  }
   0xe   : > { %s39_s23 = sadd.s32 1, %s1000_s19  ;;  %s48_s24 = sadd.s32 1, %s992_s17 }
   0xf   : > { %p41_p0 = scmp.ge.s32.totalorder %s39_s23, 2  ;;  %p55_p1 = scmp.ne.s32.totalorder %s992_s17, %s988_s16 }
  0x10   : > { %p56_p2 = scmp.eq.s32.totalorder %s1004_s20, 0  ;;  %p61_p3 = scmp.ne.s32.totalorder %s988_s16, %s984_s15 }
  0x11   : > { %s1386_s23 = smov (%p41_p0, %s39_s23), 0  ;;  %p62_p5 = scmp.eq.s32.totalorder %s1069_s21, 0 }
  0x12   : > { %1359 = sst [smem:[#allocation17_spill]] %s1386_s23  ;;  %p1081_p4 = por %p56_p2, %p55_p1 }
  0x13   : > { %s43_s26 = ssub.s32 %s1000_s19, %s1386_s23  ;;  %p139_p6 = scmp.eq.s32.totalorder %s1069_s21, 1 }
  0x14   : > { %p46_p7 = scmp.eq.s32.totalorder %s43_s26, 0  ;;  %p1089_p8 = por %p62_p5, %p61_p3 }
  0x15   : > { %p1093_p9 = por %p139_p6, %p55_p1  ;;  %p145_p10 = scmp.eq.s32.totalorder %s675_s22, 1 }
  0x16   : > { %s1361_s27 = scalar_select %p1089_p8, 1, 0 }
  0x17   : > { %s1362_s28 = scalar_select %p1093_p9, 1, 0 }
  0x18   : > { %s1098_s29 = scalar_select %p46_p7, %s992_s17, %s48_s24  }
  0x19   : > { %p1100_p11 = por %p145_p10, %p61_p3  ;;  %p740_p13 = scmp.lt.s32.totalorder %s1004_s20, 2 }
  0x1a   : > { %1363 = sst [smem:[#allocation18_spill]] %s1098_s29  ;;  %s1348_s5 = sand.u32 1, %s992_s17  }
  0x1b   : > { %s1364_s30 = scalar_select %p1100_p11, 1, 0 }
  0x1c   : > { %s1109_s6 = sshll.u32 %s1348_s5, 3  ;;  %s1112_s7 = sshll.u32 %s1000_s19, 7 }
  0x1d   : > { %p1116_p0 = pnand %p740_p13, %p1081_p4  ;;  %s212_s9 = sand.u32 1, %s1004_s20  }
  0x1e   : > { %s1366_s1 = sld [smem:[#allocation19_spill]]  ;;  %s216_s13 = scalar_lea.vmem [#allocation5], %s1109_s6 }
  0x1f   : > { %s1365_s8 = scalar_select %p1116_p0, 1, 0 }
  0x20   : > { %s223_s14 = sshll.u32 %s216_s13, 4  ;;  %s1132_s22 = scalar_lea.sflag [#allocation6], %s212_s9  ;;  %s1129_s14 = int_to_ptr.vmem [resolvable:$true] %s223_s14 }
  0x21   : > { %p1138_p4 = pneg %p1116_p0 }
  0x24   : > { %s1125_s12 = scalar_lea.hbm %s1366_s1, %s1112_s7  ;;  %s801_s11 = scalar_lea.hbm %s1366_s1, 256 }
  0x25   : > { %s796_s24 = scalar_lea.hbm %s1125_s12, 128  ;;  %p802_p7 = scmp.lt.u32.totalorder %s1125_s12, %s1366_s1 }
  0x26   : > { %p797_p3 = scmp.ne.s32.totalorder %s1125_s12, %s796_s24  ;;  %p803_p10 = scmp.lt.u32.totalorder %s801_s11, %s796_s24 }
  0x27   : > { %p805_p12 = scmp.lt.u32.totalorder %s796_s24, %s1125_s12 }
  0x28   : > { %p799_p5 = pnand %p1138_p4, %p797_p3  ;;  %p804_p13 = por %p803_p10, %p802_p7 }
  0x2a   : > { %p800_p6 = pneg %p799_p5  ;;  %p806_p1 = por %p805_p12, %p804_p13 }
  0x2c   : > { %p807_p2 = pnand %p806_p1, %p800_p6 }
  0x2e   : > { %810 = shalt.err (!%p807_p2)
}
  0x2f   : > { %s811_s9 = scalar_lea.vmem %s1129_s14, 128  ;;  %s1006_s26 = smov [#allocation5]  }
  0x30   : > { %p812_p3 = scmp.ne.s32.totalorder %s1129_s14, %s811_s9  ;;  %s816_s10 = sshll.u32 %s1006_s26, 4  ;;  %s817_s10 = int_to_ptr.vmem [resolvable:$false] %s816_s10 }
  0x31   : > { %s818_s5 = scalar_lea.vmem %s817_s10, 256  ;;  %p819_p9 = scmp.lt.s32.totalorder %s1129_s14, %s817_s10 }
  0x32   : > { %p814_p5 = pnand %p812_p3, %p1138_p4  ;;  %p820_p8 = scmp.lt.s32.totalorder %s818_s5, %s811_s9 }
  0x34   : > { %p815_p11 = pneg %p814_p5  ;;  %p821_p7 = por %p820_p8, %p819_p9 }
  0x36   : > { %p822_p10 = pnand %p821_p7, %p815_p11 }
  0x38   : > { %825 = shalt.err (!%p822_p10)
}
  0x39   : > { %729 = dma.hbm_to_vmem [thread:$0]  (!%p1116_p0), %s1125_s12, 128, %s1129_s14, %s1132_s22  }
  0x3a   : > { %p1368_p12 = scmp.lt.s32.totalorder %s1004_s20, 3  ;;  %p1369_p1 = scmp.ge.s32.totalorder %s1004_s20, 1 }
  0x3b   : > { %s1174_s9 = scalar_lea.hbm %s1343_s0, %s1112_s7  ;;  %s197_s26 = scalar_lea.vmem [#allocation2], %s1109_s6 }
  0x3c   : > { %p1166_p2 = pnand %p1369_p1, %p1368_p12  ;;  %s205_s10 = sshll.u32 %s197_s26, 4  ;;  %s1177_s10 = int_to_ptr.vmem [resolvable:$true] %s205_s10 }
  0x3d   : > { %s1183_s5 = scalar_lea.hbm %s1345_s2, %s1112_s7  ;;  %s1371_s1 = sand.u32 1, %s992_s17  }
  0x3e   : > { %s1370_s24 = scalar_select %p1166_p2, 1, 0 }
  0x3f   : > { %s194_s23 = scalar_lea.sflag [#allocation3], %s1371_s1  ;;  %s826_s19 = scalar_lea.hbm %s1174_s9, 128 }
  0x40   : > { %p827_p8 = scmp.ne.s32.totalorder %s1174_s9, %s826_s19  ;;  %s831_s29 = scalar_lea.hbm %s1343_s0, 256 }
  0x41   : > { %p832_p6 = scmp.lt.u32.totalorder %s1174_s9, %s1343_s0  ;;  %p833_p13 = scmp.lt.u32.totalorder %s831_s29, %s826_s19 }
  0x42   : > { %p829_p9 = pnand %p827_p8, %p1138_p4  ;;  %p835_p5 = scmp.lt.u32.totalorder %s826_s19, %s1174_s9 }
  0x43   : > { %p834_p3 = por %p833_p13, %p832_p6 }
  0x44   : > { %p830_p11 = pneg %p829_p9 }
  0x45   : > { %p836_p7 = por %p835_p5, %p834_p3 }
  0x47   : > { %p837_p10 = pnand %p836_p7, %p830_p11 }
  0x49   : > { %840 = shalt.err (!%p837_p10)
}
  0x4a   : > { %s841_s1 = scalar_lea.vmem %s1177_s10, 128  ;;  %s1007_s7 = smov [#allocation2]  }
  0x4b   : > { %p842_p12 = scmp.ne.s32.totalorder %s1177_s10, %s841_s1  ;;  %s846_s12 = sshll.u32 %s1007_s7, 4  ;;  %s847_s12 = int_to_ptr.vmem [resolvable:$false] %s846_s12 }
  0x4c   : > { %s848_s20 = scalar_lea.vmem %s847_s12, 256  ;;  %p849_p9 = scmp.lt.s32.totalorder %s1177_s10, %s847_s12 }
  0x4d   : > { %p844_p1 = pnand %p842_p12, %p1138_p4  ;;  %p850_p2 = scmp.lt.s32.totalorder %s848_s20, %s841_s1 }
  0x4f   : > { %p845_p8 = pneg %p844_p1  ;;  %p851_p6 = por %p850_p2, %p849_p9 }
  0x51   : > { %p852_p13 = pnand %p851_p6, %p845_p8 }
  0x53   : > { %855 = shalt.err (!%p852_p13)
}
  0x54   : > { %726 = dma.hbm_to_vmem [thread:$0]  (!%p1116_p0), %s1174_s9, 128, %s1177_s10, %s194_s23  }
  0x55   : > { %s234_s19 = scalar_lea.vmem [#allocation7], %s1109_s6  ;;  %s856_s14 = scalar_lea.hbm %s1183_s5, 128 }
  0x56   : > { %s241_s29 = sshll.u32 %s234_s19, 4  ;;  %p857_p11 = scmp.ne.s32.totalorder %s1183_s5, %s856_s14  ;;  %s242_s29 = int_to_ptr.vmem [resolvable:$true] %s241_s29 }
  0x57   : > { %s861_s26 = scalar_lea.hbm %s1345_s2, 256  ;;  %p862_p5 = scmp.lt.u32.totalorder %s1183_s5, %s1345_s2 }
  0x58   : > { %p859_p2 = pnand %p857_p11, %p1138_p4  ;;  %p863_p7 = scmp.lt.u32.totalorder %s861_s26, %s856_s14 }
  0x59   : > { %p865_p12 = scmp.lt.u32.totalorder %s856_s14, %s1183_s5 }
  0x5a   : > { %p860_p3 = pneg %p859_p2  ;;  %p864_p10 = por %p863_p7, %p862_p5 }
  0x5c   : > { %p866_p1 = por %p865_p12, %p864_p10 }
  0x5e   : > { %p867_p8 = pnand %p866_p1, %p860_p3 }
  0x60   : > { %870 = shalt.err (!%p867_p8)
}
  0x61   : > { %s871_s23 = scalar_lea.vmem %s242_s29, 128  ;;  %s1008_s6 = smov [#allocation7]  }
  0x62   : > { %p872_p9 = scmp.ne.s32.totalorder %s242_s29, %s871_s23  ;;  %s876_s9 = sshll.u32 %s1008_s6, 4  ;;  %s877_s9 = int_to_ptr.vmem [resolvable:$false] %s876_s9 }
  0x63   : > { %s878_s10 = scalar_lea.vmem %s877_s9, 256  ;;  %p879_p11 = scmp.lt.s32.totalorder %s242_s29, %s877_s9 }
  0x64   : > { %p874_p6 = pnand %p872_p9, %p1138_p4  ;;  %p880_p2 = scmp.lt.s32.totalorder %s878_s10, %s871_s23 }
  0x66   : > { %p875_p13 = pneg %p874_p6  ;;  %p881_p0 = por %p880_p2, %p879_p11 }
  0x68   : > { %p882_p5 = pnand %p881_p0, %p875_p13 }
  0x6a   : > { %885 = shalt.err (!%p882_p5)
}
  0x6b   : > { %p1372_p7 = scmp.ne.s32.totalorder %s1365_s8, 0  ;;  %p1373_p3 = scmp.ne.s32.totalorder %s1370_s24, 0 }
  0x6c   : > { %s1230_s25 = sand.u32 (!%p1373_p3), 1, %s988_s16   ;;  %p1374_p0 = scmp.ne.s32.totalorder (!%p1373_p3), %s1361_s27, 0 }
  0x6d   : > { %732 = dma.hbm_to_vmem [thread:$0]  (!%p1372_p7), %s1183_s5, 128, %s242_s29, %s1132_s22  }
  0x6e   : > { %250 = sbr.rel (%p1373_p3) target bundleno = 725 (0x2d5), region = 32  ;;  %s1233_s12 = sshll.u32 (!%p1373_p3), %s1230_s25, 3 }
  0x6f   : > { %s253_s20 = scalar_lea.sflag (!%p1373_p3), [#allocation3], %s1230_s25  ;;  %s256_s19 = scalar_lea.vmem (!%p1373_p3), [#allocation2], %s1233_s12 }
  0x75   : > { %967 = dma.done.wait (%p1374_p0), %s253_s20, 128  }
  0x76   : > { %969 = vsyncadd (%p1374_p0), %s253_s20, 4294967168  ;;  %s261_s8 = sand.u32 1, %s1069_s21   ;;  %s265_s24 = scalar_lea.vmem [#allocation5], %s1233_s12 }
  0x77   : > { %s262_s22 = scalar_lea.sflag [#allocation6], %s261_s8 }
  0x78   : > { %971 = dma.done.wait (%p1374_p0), %s262_s22, 256  }
  0x79   : > { %973 = vsyncadd (%p1374_p0), %s262_s22, 4294967040  ;;  %v1009_v0 = vmov 0.0   ;;  %vm1010_vm0 = vmmov 0   ;;  %vm318_vm1 = vcmask 261120   ;;  %v315_v1 = vld [vmem:[%s265_s24] sm:$0xff]  ;;  %v314_v2 = vld [vmem:[%s256_s19] sm:$0xff] }
  0x7a   : > { %703 = vmatprep.subr.mxu0 %v1009_v0  ;;  %705 = vmatprep.mubr.msk.f32.mxu0 %vm1010_vm0, %v1009_v0  ;;  %v317_v3 = vmul.f32 0.17677669, %v314_v2  ;;  %vm395_vm2 = vcmask 64512   ;;  %s274_s21 = scalar_lea.vmem [#allocation7], %s1233_s12  ;;  %s695_s27 = sshll.u32 %s996_s18, 7 }
  0x7b   : > { %708 = vmatprep.subr.mxu1 %v1009_v0  ;;  %710 = vmatprep.mubr.msk.f32.mxu1 %vm1010_vm0, %v1009_v0  ;;  %v316_v7 = vld [vmem:[%s274_s21] sm:$0xff]  ;;  %s313_s5 = scalar_lea.vmem [#allocation9], %s1233_s12  ;;  %s1260_s13 = scalar_lea.hbm %s1347_s4, %s695_s27 }
  0x7c   : > { %704 = vmatpush3.xpose.msk.msra.mxu0 %vm318_vm1, %v315_v1  ;;  %709 = vmatpush3.msra.mxu1 %v316_v7  ;;  %s518_s29 = sshll.u32 %s313_s5, 4  ;;  %s490_s26 = scalar_lea.sflag [#allocation10], %s1230_s25  ;;  %s1262_s29 = int_to_ptr.vmem [resolvable:$true] %s518_s29 }
  0x7d   : > { %s886_s1 = scalar_lea.vmem %s1262_s29, 128  ;;  %p1375_p10 = scmp.ne.s32.totalorder %s1362_s28, 0 }
  0x7e   : > { %p887_p4 = scmp.ne.s32.totalorder %s1262_s29, %s886_s1  ;;  %s1011_s7 = smov [#allocation9]  }
  0x7f   : > { %706 = vmatmul.mubr.msk.f32.vlgmr.msra.gmra.mrb[0].mxu0 %vm318_vm1, %v317_v3  ;;  %s890_s23 = sshll.u32 %s1011_s7, 4  ;;  %s891_s23 = int_to_ptr.vmem [resolvable:$false] %s890_s23 }
  0x80   : > { %p888_p12 = pnand %p887_p4, %p1375_p10  ;;  %s892_s6 = scalar_lea.vmem %s891_s23, 256 }
  0x81   : > { %p893_p8 = scmp.lt.s32.totalorder %s1262_s29, %s891_s23  ;;  %p894_p9 = scmp.lt.s32.totalorder %s892_s6, %s886_s1 }
  0x82   : > { %p889_p1 = pneg %p888_p12 }
  0x83   : > { %p895_p6 = por %p894_p9, %p893_p8 }
  0x85   : > { %p896_p13 = pnand %p895_p6, %p889_p1 }
 0x152   : > { %v391_v4 = vpop.f32.mrb[0].mxu0 }
 0x153   : > { %v707_v5 = vpop.f32.mrb[1].mxu0  ;;  %v396_v6 = vsel %vm395_vm2, %v391_v4, -inf }
 0x154   : > { %397 = vmax.xlane.f32.xlu0 %v396_v6 }
 0x1e1   : > { %v398_v8 = vpop.xlane.xlu0 %397 }
 0x1e2   : > { %v399_v9 = vsub.f32 %v391_v4, %v398_v8 }
 0x1e4   : > { %v400_v10 = vmul.f32 1.442695, %v399_v9 }
 0x1e6   : > { %792 = vpow2.f32 %v400_v10 }
 0x1f0   : > { %v793_v11 = vpop.eup %792 }
 0x1f1   : > { %711 = vmatmul.mubr.msk.f32.vlgmr.msra.gmra.mrb[0].mxu1 %vm395_vm2, %v793_v11  ;;  %v402_v12 = vsel %vm395_vm2, %v793_v11, 0.0 }
 0x1f2   : > { %403 = vadd.xlane.f32.xlu0 %v402_v12 }
 0x27f   : > { %v404_v13 = vpop.xlane.xlu0 %403 }
 0x280   : > { %794 = vrcp.f32 %v404_v13 }
 0x28a   : > { %v795_v14 = vpop.eup %794 }
 0x28b   : > { %v482_v15 = vmul.f32 %v795_v14, %v793_v11 }
 0x28d   : > { %483 = vst.msk [vmem:[%s313_s5] sm:$0xff] %vm395_vm2, %v482_v15 }
 0x28e   : > { %899 = shalt.err (!%p896_p13)
}
 0x28f   : > { %s900_s9 = scalar_lea.hbm %s1260_s13, 128  ;;  %s904_s19 = scalar_lea.hbm %s1347_s4, 256 }
 0x290   : > { %p901_p11 = scmp.ne.s32.totalorder %s1260_s13, %s900_s9  ;;  %p905_p7 = scmp.lt.u32.totalorder %s1260_s13, %s1347_s4 }
 0x291   : > { %p906_p3 = scmp.lt.u32.totalorder %s904_s19, %s900_s9  ;;  %p908_p4 = scmp.lt.u32.totalorder %s900_s9, %s1260_s13 }
 0x292   : > { %p902_p2 = pnand %p901_p11, %p1375_p10 }
 0x293   : > { %p907_p0 = por %p906_p3, %p905_p7 }
 0x294   : > { %p903_p5 = pneg %p902_p2 }
 0x295   : > { %p909_p12 = por %p908_p4, %p907_p0 }
 0x297   : > { %p910_p1 = pnand %p909_p12, %p903_p5 }
 0x299   : > { %913 = shalt.err (!%p910_p1)
}
 0x29a   : > { %720 = dma.vmem_to_hbm [thread:$0]  (%p1375_p10), %s1262_s29, 128, %s1260_s13, %s490_s26  }
 0x29b   : > { %s306_s24 = scalar_lea.vmem [#allocation8], %s1233_s12  ;;  %s1293_s11 = scalar_lea.hbm %s1346_s3, %s695_s27 }
 0x29c   : > { %s504_s21 = sshll.u32 %s306_s24, 4  ;;  %s485_s1 = scalar_lea.sflag [#allocation4], %s1230_s25  ;;  %s1295_s21 = int_to_ptr.vmem [resolvable:$true] %s504_s21 }
 0x29d   : > { %s914_s29 = scalar_lea.vmem %s1295_s21, 128  ;;  %s1012_s12 = smov [#allocation8]  }
 0x29e   : > { %p915_p8 = scmp.ne.s32.totalorder %s1295_s21, %s914_s29  ;;  %s918_s18 = sshll.u32 %s1012_s12, 4  ;;  %s919_s18 = int_to_ptr.vmem [resolvable:$false] %s918_s18 }
 0x29f   : > { %s920_s13 = scalar_lea.vmem %s919_s18, 256  ;;  %p921_p13 = scmp.lt.s32.totalorder %s1295_s21, %s919_s18 }
 0x2a0   : > { %p916_p9 = pnand %p915_p8, %p1375_p10  ;;  %p922_p11 = scmp.lt.s32.totalorder %s920_s13, %s914_s29 }
 0x2a2   : > { %p917_p6 = pneg %p916_p9  ;;  %p923_p2 = por %p922_p11, %p921_p13 }
 0x2a4   : > { %p924_p5 = pnand %p923_p2, %p917_p6 }
 0x2c4   : > { %v474_v16 = vpop.f32.mrb[0].mxu1 }
 0x2c5   : > { %v480_v17 = vmul.f32 %v795_v14, %v474_v16  ;;  %v712_v18 = vpop.f32.mrb[1].mxu1 }
 0x2c7   : > { %481 = vst.msk [vmem:[%s306_s24] sm:$0xff] %vm318_vm1, %v480_v17 }
 0x2c8   : > { %927 = shalt.err (!%p924_p5)
}
 0x2c9   : > { %s928_s25 = scalar_lea.hbm %s1293_s11, 128  ;;  %s932_s7 = scalar_lea.hbm %s1346_s3, 256 }
 0x2ca   : > { %p929_p7 = scmp.ne.s32.totalorder %s1293_s11, %s928_s25  ;;  %p933_p4 = scmp.lt.u32.totalorder %s1293_s11, %s1346_s3 }
 0x2cb   : > { %p934_p12 = scmp.lt.u32.totalorder %s932_s7, %s928_s25  ;;  %p936_p8 = scmp.lt.u32.totalorder %s928_s25, %s1293_s11 }
 0x2cc   : > { %p930_p3 = pnand %p929_p7, %p1375_p10 }
 0x2cd   : > { %p935_p1 = por %p934_p12, %p933_p4 }
 0x2ce   : > { %p931_p0 = pneg %p930_p3 }
 0x2cf   : > { %p937_p9 = por %p936_p8, %p935_p1 }
 0x2d1   : > { %p938_p6 = pnand %p937_p9, %p931_p0 }
 0x2d3   : > { %941 = shalt.err (!%p938_p6)
}
 0x2d4   : > { %719 = dma.vmem_to_hbm [thread:$0]  (%p1375_p10), %s1295_s21, 128, %s1293_s11, %s485_s1  }
 0x2d5 PF: > { %s1376_s9 = sld [smem:[#allocation16_spill]]  ;;  %s530_s10 = sand.u32 1, %s984_s15  }
 0x2d6   : > { %p1377_p13 = scmp.ne.s32.totalorder %s1364_s30, 0  ;;  %s531_s20 = scalar_lea.sflag [#allocation4], %s530_s10 }
 0x2db   : > { %p1378_p11 = scmp.ge.s32.totalorder %s1376_s9, 2 }
 0x2dd   : > { %p734_p2 = pnand %p1378_p11, %p1377_p13 }
 0x2df   : > { %975 = dma.done.wait (!%p734_p2), %s531_s20, 128  }
 0x2e0   : > { %977 = vsyncadd (!%p734_p2), %s531_s20, 4294967168  ;;  %s540_s19 = scalar_lea.sflag [#allocation10], %s530_s10 }
 0x2e1   : > { %979 = dma.done.wait (!%p734_p2), %s540_s19, 128  }
 0x2e2   : > { %981 = vsyncadd (!%p734_p2), %s540_s19, 4294967168  ;;  %s27_s20 = sadd.s32 1, %s1376_s9   ;;  %s1379_s28 = sld [smem:[#allocation18_spill]] }
 0x2e3   : > { %p24_p5 = scmp.ge.s32.totalorder %s27_s20, 4   ;;  %s1380_s18 = sld [smem:[#allocation15_spill]] }
 0x2e4   : > { %s1381_s19 = sld [smem:[#allocation17_spill]]  ;;  %s1382_s15 = smov %s988_s16 }
 0x2e5   : > { %s1383_s16 = smov %s992_s17  ;;  %26 = sbr.rel (!%p24_p5) target bundleno = 12 (0xc), region = 118 }
 0x2e8   : > { %s1384_s17 = smov %s1379_s28 }
 0x2ec   :  { %545 = vsyncpa [#allocation3], 1 }
 0x2ed   :  { %547 = vsyncpa [#allocation3 + $0x1], 1 }
 0x2ee   :  { %548 = vsyncpa [#allocation6], 1 }
 0x2ef   :  { %550 = vsyncpa [#allocation6 + $0x1], 1 }
 0x2f0   :  { %551 = vsyncpa [#allocation4], 1 }
 0x2f1   :  { %553 = vsyncpa [#allocation4 + $0x1], 1 }
 0x2f2   :  { %554 = vsyncpa [#allocation10], 1 }
 0x2f3   :  { %556 = vsyncpa [#allocation10 + $0x1], 1 }

</bundles_post_ra>
